<compile_context>
chip_gen: v7x
topology: tpu7x:2x2x1
jax: 0.10.0
libtpu: 0.0.40
codegen_flags: <defaults>
</compile_context>

<pallas_src>
import functools

import jax
import jax.numpy as jnp
from jax.experimental import pallas as pl
from jax.experimental.pallas import tpu as pltpu


# ---------------------------------------------------------------------------
# Kernel bodies
# ---------------------------------------------------------------------------
def _tile_row_partial(x_ref, y_ref, *, c, tc, need_col_mask):
    """Per-row partial KL sums for the current (row, col) tile -> (tb, 1) f32."""
    x = x_ref[...].astype(jnp.float32)
    y = y_ref[...].astype(jnp.float32)
    # xlogy(y, y) - y*x  ==  y * (log(y) - x), with y == 0 contributing 0.
    safe_log_y = jnp.log(jnp.where(y > 0.0, y, 1.0))
    term = y * (safe_log_y - x)
    if need_col_mask:
        # Only emitted when C % tc != 0: the last column tile is partial and
        # its out-of-bounds lanes hold garbage that must not reach the sums.
        j = pl.program_id(1)
        col_ids = jax.lax.broadcasted_iota(jnp.int32, term.shape, 1)
        term = jnp.where(col_ids < (c - j * tc), term, 0.0)
    return jnp.sum(term, axis=1, keepdims=True)


def _kldiv_kernel(x_ref, y_ref, o_ref, *, c, tc, need_col_mask):
    j = pl.program_id(1)

    @pl.when(j == 0)
    def _init():
        o_ref[...] = jnp.zeros_like(o_ref)

    # Output block (tb, 1) is resident across the column ("arbitrary") axis.
    o_ref[...] += _tile_row_partial(
        x_ref, y_ref, c=c, tc=tc, need_col_mask=need_col_mask)


def _kldiv_kernel_weighted(x_ref, y_ref, w_ref, o_ref, *, c, tc, need_col_mask):
    j = pl.program_id(1)

    @pl.when(j == 0)
    def _init():
        o_ref[...] = jnp.zeros_like(o_ref)

    o_ref[...] += _tile_row_partial(
        x_ref, y_ref, c=c, tc=tc, need_col_mask=need_col_mask)

    @pl.when(j == pl.num_programs(1) - 1)
    def _finalize():
        o_ref[...] = o_ref[...] * w_ref[...]


# ---------------------------------------------------------------------------
# Wrapper
# ---------------------------------------------------------------------------
# ~6 MiB per single input block => 2 inputs x 2 pipeline buffers ~ 24 MiB of
# VMEM.  Fits v7x's 64 MiB with headroom and is far past the step-overhead
# regime (>85% of HBM roofline) on v5e/v6e.
_PER_BLOCK_BYTES = 6 * 1024 * 1024
_VMEM_LIMIT_BYTES = 48 * 1024 * 1024  # below v7x's 64 MiB physical VMEM


def _choose_tiles(b, c, x_dtype, y_dtype):
    x_sz = jnp.dtype(x_dtype).itemsize
    y_sz = jnp.dtype(y_dtype).itemsize
    itemsize = max(x_sz, y_sz)
    row_align = max(8, 32 // min(x_sz, y_sz))  # sublane packing: f32=8, bf16=16

    max_block_elems = _PER_BLOCK_BYTES // itemsize
    if c * 128 <= max_block_elems:
        tc = c  # whole rows fit comfortably: no column tiling needed
    else:
        # Wide-C case (e.g. vocab-scale): lane-aligned column tile, keep the
        # row tile large so the DMA pipeline stays saturated.
        # TODO(synk): sweep pipeline_mode=pl.Buffered(3) on the row specs (v7x).
        tc = max(128, min(2048, (max_block_elems // 512) // 128 * 128))

    if b <= row_align:
        tb = b  # block equals full row dim (always legal)
    else:
        tb = min(max_block_elems // tc, b)
        tb = max(row_align, (tb // row_align) * row_align)
    return tb, tc


def kldiv_loss(x, y, weights=None, epsilon=1e-10):
    """Pallas-TPU equivalent of KLDivloss.forward (epsilon unused, as in torch)."""
    del epsilon
    x = jnp.asarray(x)
    y = jnp.asarray(y)
    b, c = x.shape

    tb, tc = _choose_tiles(b, c, x.dtype, y.dtype)
    nr, nc = pl.cdiv(b, tb), pl.cdiv(c, tc)
    need_col_mask = (c % tc) != 0

    in_spec = pl.BlockSpec((tb, tc), lambda i, j: (i, j))
    out_spec = pl.BlockSpec((tb, 1), lambda i, j: (i, 0))
    out_shape = jax.ShapeDtypeStruct((b, 1), jnp.float32)
    cparams = pltpu.CompilerParams(
        dimension_semantics=("parallel", "arbitrary"),
        vmem_limit_bytes=_VMEM_LIMIT_BYTES,
    )

    if weights is None:
        rows = pl.pallas_call(
            functools.partial(_kldiv_kernel, c=c, tc=tc,
                              need_col_mask=need_col_mask),
            out_shape=out_shape,
            grid=(nr, nc),
            in_specs=[in_spec, in_spec],
            out_specs=out_spec,
            compiler_params=cparams,
        )(x, y)
    else:
        w = jnp.asarray(weights).astype(jnp.float32).reshape(b, 1)
        w_spec = pl.BlockSpec((tb, 1), lambda i, j: (i, 0))
        rows = pl.pallas_call(
            functools.partial(_kldiv_kernel_weighted, c=c, tc=tc,
                              need_col_mask=need_col_mask),
            out_shape=out_shape,
            grid=(nr, nc),
            in_specs=[in_spec, in_spec, w_spec],
            out_specs=out_spec,
            compiler_params=cparams,
        )(x, y, w)

    # Tiny final reduction over B scalars + mean scaling stays in XLA.
    return jnp.sum(rows) / b


# ---------------------------------------------------------------------------
if __name__ == "__main__":
    key = jax.random.PRNGKey(0)
    k1, k2, k3 = jax.random.split(key, 3)

    b, c = 52, 200  # small and deliberately unaligned (partial row blocks)
    x = jax.nn.log_softmax(jax.random.normal(k1, (b, c), jnp.float32), axis=1)
    y = jax.nn.softmax(jax.random.normal(k2, (b, c), jnp.float32), axis=1)
    w = jax.random.uniform(k3, (b,), jnp.float32, minval=0.5, maxval=1.5)

    loss_w = kldiv_loss(x, y, w)
    loss_nw = kldiv_loss(x, y, None)
    # bf16 inputs stream as bf16 (no wrapper up-cast); math is f32 in-kernel.
    loss_bf = kldiv_loss(x.astype(jnp.bfloat16), y.astype(jnp.bfloat16), None)
    jax.block_until_ready((loss_w, loss_nw, loss_bf))

    # Pure-JAX reference (torch.nn.KLDivLoss(reduction='none') semantics).
    def ref_loss(xv, yv, wv=None):
        pointwise = (jnp.where(yv > 0, yv * jnp.log(jnp.where(yv > 0, yv, 1.0)), 0.0)
                     - yv * xv)
        rows = pointwise.sum(axis=1)
        if wv is not None:
            rows = rows * wv
        return rows.mean()

    ref_w = ref_loss(x, y, w)
    ref_nw = ref_loss(x, y)
    xb = x.astype(jnp.bfloat16).astype(jnp.float32)
    yb = y.astype(jnp.bfloat16).astype(jnp.float32)
    ref_bf = ref_loss(xb, yb)

    assert loss_w.shape == () and loss_nw.shape == () and loss_bf.shape == ()
    assert jnp.allclose(loss_w, ref_w, rtol=1e-5, atol=1e-5), (loss_w, ref_w)
    assert jnp.allclose(loss_nw, ref_nw, rtol=1e-5, atol=1e-5), (loss_nw, ref_nw)
    assert jnp.allclose(loss_bf, ref_bf, rtol=1e-3, atol=1e-3), (loss_bf, ref_bf)
    print("KERNEL_OK")
</pallas_src>

<mosaic_0001>
module attributes {stable_mosaic.version = 11 : i64} {
  func.func @_kldiv_kernel_weighted(%arg0: i32, %arg1: i32, %arg2: memref<48x200xf32, #tpu.memory_space<vmem>>, %arg3: memref<48x200xf32, #tpu.memory_space<vmem>>, %arg4: memref<48x1xf32, #tpu.memory_space<vmem>>, %arg5: memref<48x1xf32, #tpu.memory_space<vmem>>) attributes {dimension_semantics = [#tpu.dimension_semantics<parallel>, #tpu.dimension_semantics<arbitrary>], iteration_bounds = array<i64: 2, 1>, scalar_prefetch = 0 : i64, scratch_operands = 0 : i64, tpu.core_type = #tpu.core_type<tc>, window_params = [{transform_indices = @transform_0, window_bounds = array<i64: 48, 200>}, {transform_indices = @transform_1, window_bounds = array<i64: 48, 200>}, {transform_indices = @transform_2, window_bounds = array<i64: 48, 1>}, {transform_indices = @transform_3, window_bounds = array<i64: 48, 1>}]} {
    %c0_i32 = arith.constant 0 : i32
    %0 = arith.cmpi eq, %arg1, %c0_i32 : i32
    %1 = arith.extui %0 : i1 to i32
    %c0_i32_0 = arith.constant 0 : i32
    %2 = arith.cmpi ne, %1, %c0_i32_0 : i32
    scf.if %2 {
      %cst_12 = arith.constant 0.000000e+00 : f32
      %20 = vector.broadcast %cst_12 : f32 to vector<48x1xf32>
      %c0_13 = arith.constant 0 : index
      %c0_14 = arith.constant 0 : index
      %21 = vector.load %arg5[%c0_13, %c0_14] : memref<48x1xf32, #tpu.memory_space<vmem>>, vector<48x1xf32>
      tpu.vector_store %arg5[%c0_13, %c0_14], %20 {strides = array<i32>} : memref<48x1xf32, #tpu.memory_space<vmem>>, vector<48x1xf32>,
    } else {
    }
    %c0 = arith.constant 0 : index
    %c0_1 = arith.constant 0 : index
    %3 = vector.load %arg5[%c0, %c0_1] : memref<48x1xf32, #tpu.memory_space<vmem>>, vector<48x1xf32>
    %c0_2 = arith.constant 0 : index
    %c0_3 = arith.constant 0 : index
    %4 = vector.load %arg2[%c0_2, %c0_3] : memref<48x200xf32, #tpu.memory_space<vmem>>, vector<48x200xf32>
    %c0_4 = arith.constant 0 : index
    %c0_5 = arith.constant 0 : index
    %5 = vector.load %arg3[%c0_4, %c0_5] : memref<48x200xf32, #tpu.memory_space<vmem>>, vector<48x200xf32>
    %cst = arith.constant 0.000000e+00 : f32
    %6 = vector.broadcast %cst : f32 to vector<48x200xf32>
    %7 = arith.cmpf ogt, %5, %6 : vector<48x200xf32>
    %cst_6 = arith.constant 1.000000e+00 : f32
    %8 = vector.broadcast %cst_6 : f32 to vector<48x200xf32>
    %9 = arith.select %7, %5, %8 : vector<48x200xi1>, vector<48x200xf32>
    %10 = math.log %9 : vector<48x200xf32>
    %11 = arith.subf %10, %4 : vector<48x200xf32>
    %12 = arith.mulf %5, %11 : vector<48x200xf32>
    %cst_7 = arith.constant dense<0.000000e+00> : vector<48xf32>
    %13 = vector.multi_reduction <add>, %12, %cst_7 [1] : vector<48x200xf32> to vector<48xf32>
    %14 = vector.shape_cast %13 : vector<48xf32> to vector<48x1xf32>
    %15 = arith.addf %3, %14 : vector<48x1xf32>
    %c0_8 = arith.constant 0 : index
    %c0_9 = arith.constant 0 : index
    %16 = vector.load %arg5[%c0_8, %c0_9] : memref<48x1xf32, #tpu.memory_space<vmem>>, vector<48x1xf32>
    tpu.vector_store %arg5[%c0_8, %c0_9], %15 {strides = array<i32>} : memref<48x1xf32, #tpu.memory_space<vmem>>, vector<48x1xf32>,
    %c0_i32_10 = arith.constant 0 : i32
    %17 = arith.cmpi eq, %arg1, %c0_i32_10 : i32
    %18 = arith.extui %17 : i1 to i32
    %c0_i32_11 = arith.constant 0 : i32
    %19 = arith.cmpi ne, %18, %c0_i32_11 : i32
    scf.if %19 {
      %c0_12 = arith.constant 0 : index
      %c0_13 = arith.constant 0 : index
      %20 = vector.load %arg5[%c0_12, %c0_13] : memref<48x1xf32, #tpu.memory_space<vmem>>, vector<48x1xf32>
      %c0_14 = arith.constant 0 : index
      %c0_15 = arith.constant 0 : index
      %21 = vector.load %arg4[%c0_14, %c0_15] : memref<48x1xf32, #tpu.memory_space<vmem>>, vector<48x1xf32>
      %22 = arith.mulf %20, %21 : vector<48x1xf32>
      %c0_16 = arith.constant 0 : index
      %c0_17 = arith.constant 0 : index
      %23 = vector.load %arg5[%c0_16, %c0_17] : memref<48x1xf32, #tpu.memory_space<vmem>>, vector<48x1xf32>
      tpu.vector_store %arg5[%c0_16, %c0_17], %22 {strides = array<i32>} : memref<48x1xf32, #tpu.memory_space<vmem>>, vector<48x1xf32>,
    } else {
    }
    return
  }
  func.func @transform_0(%arg0: i32, %arg1: i32) -> (i32, i32) {
    %c0_i32 = arith.constant 0 : i32
    return %arg0, %arg1 : i32, i32
  }
  func.func @transform_1(%arg0: i32, %arg1: i32) -> (i32, i32) {
    %c0_i32 = arith.constant 0 : i32
    return %arg0, %arg1 : i32, i32
  }
  func.func @transform_2(%arg0: i32, %arg1: i32) -> (i32, i32) {
    %c0_i32 = arith.constant 0 : i32
    %c0_i32_0 = arith.constant 0 : i32
    return %arg0, %c0_i32 : i32, i32
  }
  func.func @transform_3(%arg0: i32, %arg1: i32) -> (i32, i32) {
    %c0_i32 = arith.constant 0 : i32
    %c0_i32_0 = arith.constant 0 : i32
    return %arg0, %c0_i32 : i32, i32
  }
}

</mosaic_0001>

<bundles_post_ra>
// kernel: tpu_custom_call.1
= control target key start
LH: loop header
LB: loop body
LE: loop exit
PB: predicated region body
PF: predicated region fallthrough
CT: control target
= control target key end

     0   :  { %8 = vsyncpa [#allocation3], 0  ;;  %s1571_s0 = inlined_call_operand.hbm [shape: f32[52,200], index: 0, kind: input, shape index: {}]   ;;  %s1572_s1 = inlined_call_operand.hbm [shape: f32[52,200], index: 1, kind: input, shape index: {}]   ;;  %s1573_s2 = inlined_call_operand.vmem [shape: f32[52,1], index: 2, kind: input, shape index: {}]   ;;  %s1574_s3 = inlined_call_operand.vmem [shape: f32[52,1], index: 3, kind: output, shape index: {}]  }
   0x1   :  { %10 = vsyncpa [#allocation3 + $0x1], 0 }
   0x2   :  { %11 = vsyncpa [#allocation5], 0 }
   0x3   :  { %13 = vsyncpa [#allocation5 + $0x1], 0  ;;  %s1193_s12 = smov 0   ;;  %s1195_s13 = smov 0  }
   0x4   :  { %s1197_s14 = smov 0   ;;  %s1199_s15 = smov 0  }
   0x5   :  { %s1201_s16 = smov 0   ;;  %s1203_s17 = smov 0  }
   0x6 LB: > { %s797_s18 = sadd.s32 4294967295, %s1132_s17   ;;  %s31_s19 = sadd.s32 1, %s1128_s16  ;;  %s1132_s17 = sphi %s1203_s17, %s19_s17   ;;  %s1128_s16 = sphi %s1201_s16, %s1586_s16   ;;  %s1124_s15 = sphi %s1199_s15, %s1585_s15   ;;  %s1120_s14 = sphi %s1197_s14, %s1584_s14   ;;  %s1116_s13 = sphi %s1195_s13, %s1583_s13   ;;  %s1112_s12 = sphi %s1193_s12, %s1582_s12  }
   0x7   : > { %p33_p0 = scmp.ge.s32.totalorder %s31_s19, 2  ;;  %s40_s20 = sadd.s32 1, %s1120_s14 }
   0x8   : > { %p47_p1 = scmp.ne.s32.totalorder %s1120_s14, %s1116_s13  ;;  %p48_p2 = scmp.eq.s32.totalorder %s1132_s17, 0 }
   0x9   : > { %s1588_s19 = smov (%p33_p0, %s31_s19), 0  ;;  %p53_p4 = scmp.ne.s32.totalorder %s1116_s13, %s1112_s12 }
   0xa   : > { %p1229_p3 = por %p48_p2, %p47_p1  ;;  %s35_s22 = ssub.s32 %s1128_s16, %s1588_s19 }
   0xb   : > { %p54_p5 = scmp.eq.s32.totalorder %s797_s18, 0  ;;  %p38_p6 = scmp.eq.s32.totalorder %s35_s22, 0 }
   0xc   : > { %p131_p7 = scmp.eq.s32.totalorder %s797_s18, 1  ;;  %p800_p10 = scmp.ge.s32.totalorder %s1132_s17, 2 }
   0xd   : > { %p1236_p8 = por %p54_p5, %p53_p4 }
   0xe   : > { %s1241_s24 = scalar_select %p38_p6, %s1120_s14, %s40_s20  }
   0xf   : > { %p1243_p9 = por %p131_p7, %p47_p1  ;;  %153 = sbr.rel (%p800_p10) target bundleno = 92 (0x5c), region = 16 }
  0x11   : > { %s1577_s25 = scalar_select %p1243_p9, 1, 0 }
  0x16   : > { %156 = sbr.rel (!%p1229_p3) target bundleno = 57 (0x39), region = 20  ;;  %s157_s26 = sand.u32 (%p1229_p3), 1, %s1120_s14  }
  0x17   : > { %s162_s27 = smul.u32 (%p1229_p3), 6, %s1128_s16  ;;  %s1255_s5 = scalar_lea.sflag (%p1229_p3), [#allocation3], %s157_s26 }
  0x18   : > { %s838_s28 = smul.u32 (%p1229_p3), 96, %s157_s26 }
  0x19   : > { %s164_s29 = ssub.s32 (%p1229_p3), 7, %s162_s27 }
  0x1a   : > { %p165_p11 = scmp.lt.s32.totalorder (%p1229_p3), %s164_s29, 6  ;;  %s161_s6 = scalar_lea.vmem (%p1229_p3), [#allocation2], %s838_s28 }
  0x1d   : > { %s1590_s29 = smov (!%p165_p11, %s164_s29), 6 }
  0x1e   : > { %s1252_s30 = sshll.u32 %s1590_s29, 8 }
  0x1f   : > { %s170_s4 = ssub.s32 1536, %s1252_s30 }
  0x20   : > { %171 = vsyncadd %s1255_s5, %s170_s4  ;;  %p803_p12 = scmp.ne.s32.totalorder %s1252_s30, 0  ;;  %s836_s7 = smul.u32 1536, %s1128_s16 }
  0x21   : > { %s178_s8 = sshll.u32 %s161_s6, 4  ;;  %s994_s22 = scalar_lea.hbm %s1571_s0, 1792  ;;  %s1265_s8 = int_to_ptr.vmem [resolvable:$true] %s178_s8 }
  0x22   : > { %s1263_s11 = scalar_lea.hbm %s1571_s0, %s836_s7 }
  0x23   : > { %s990_s12 = scalar_lea.hbm %s1263_s11, %s1252_s30  ;;  %p995_p2 = scmp.lt.u32.totalorder %s1263_s11, %s1571_s0 }
  0x24   : > { %p991_p13 = scmp.ne.s32.totalorder %s1263_s11, %s990_s12  ;;  %p996_p4 = scmp.lt.u32.totalorder %s994_s22, %s990_s12 }
  0x25   : > { %p998_p6 = scmp.lt.u32.totalorder %s990_s12, %s1263_s11 }
  0x26   : > { %p992_p0 = pnand %p991_p13, %p803_p12  ;;  %p997_p5 = por %p996_p4, %p995_p2 }
  0x28   : > { %p993_p1 = pneg %p992_p0  ;;  %p999_p7 = por %p998_p6, %p997_p5 }
  0x2a   : > { %p1000_p10 = pnand %p999_p7, %p993_p1 }
  0x2c   : > { %1003 = shalt.err (!%p1000_p10)
}
  0x2d   : > { %s1004_s28 = scalar_lea.vmem %s1265_s8, %s1252_s30  ;;  %s1166_s29 = smov [#allocation2]  }
  0x2e   : > { %p1005_p11 = scmp.ne.s32.totalorder %s1265_s8, %s1004_s28  ;;  %s1008_s4 = sshll.u32 %s1166_s29, 4  ;;  %s1009_s4 = int_to_ptr.vmem [resolvable:$false] %s1008_s4 }
  0x2f   : > { %s1010_s6 = scalar_lea.vmem %s1009_s4, 3072  ;;  %p1011_p9 = scmp.lt.s32.totalorder %s1265_s8, %s1009_s4 }
  0x30   : > { %p1006_p13 = pnand %p1005_p11, %p803_p12  ;;  %p1012_p2 = scmp.lt.s32.totalorder %s1010_s6, %s1004_s28 }
  0x32   : > { %p1007_p0 = pneg %p1006_p13  ;;  %p1013_p4 = por %p1012_p2, %p1011_p9 }
  0x34   : > { %p1014_p5 = pnand %p1013_p4, %p1007_p0 }
  0x36   : > { %1017 = shalt.err (!%p1014_p5)
}
  0x37   : > { %s1167_s7 = smov 256   ;;  %s1168_s9 = smov 16  }
  0x38   : > { %184 = dma.hbm_to_vmem [thread:$0]  (%p803_p12), %s1263_s11, %s1252_s30, %s1265_s8, %s1255_s5, %s1167_s7, %s1167_s7, %s1168_s9  }
  0x39 PF: > { %187 = sbr.rel (!%p1229_p3) target bundleno = 92 (0x5c), region = 24  ;;  %s188_s10 = sand.u32 (%p1229_p3), 1, %s1120_s14  }
  0x3a   : > { %s193_s12 = smul.u32 (%p1229_p3), 6, %s1128_s16  ;;  %s1299_s27 = scalar_lea.sflag (%p1229_p3), [#allocation5], %s188_s10 }
  0x3b   : > { %s839_s18 = smul.u32 (%p1229_p3), 96, %s188_s10 }
  0x3c   : > { %s195_s20 = ssub.s32 (%p1229_p3), 7, %s193_s12 }
  0x3d   : > { %p196_p9 = scmp.lt.s32.totalorder (%p1229_p3), %s195_s20, 6  ;;  %s192_s30 = scalar_lea.vmem (%p1229_p3), [#allocation4], %s839_s18 }
  0x40   : > { %s1592_s20 = smov (!%p196_p9, %s195_s20), 6 }
  0x41   : > { %s1296_s22 = sshll.u32 %s1592_s20, 8 }
  0x42   : > { %s201_s26 = ssub.s32 1536, %s1296_s22 }
  0x43   : > { %202 = vsyncadd %s1299_s27, %s201_s26  ;;  %p810_p3 = scmp.ne.s32.totalorder %s1296_s22, 0  ;;  %s837_s21 = smul.u32 1536, %s1128_s16 }
  0x44   : > { %s209_s5 = sshll.u32 %s192_s30, 4  ;;  %s1022_s7 = scalar_lea.hbm %s1572_s1, 1792  ;;  %s1309_s5 = int_to_ptr.vmem [resolvable:$true] %s209_s5 }
  0x45   : > { %s1307_s28 = scalar_lea.hbm %s1572_s1, %s837_s21 }
  0x46   : > { %s1018_s29 = scalar_lea.hbm %s1307_s28, %s1296_s22  ;;  %p1023_p7 = scmp.lt.u32.totalorder %s1307_s28, %s1572_s1 }
  0x47   : > { %p1019_p12 = scmp.ne.s32.totalorder %s1307_s28, %s1018_s29  ;;  %p1024_p10 = scmp.lt.u32.totalorder %s1022_s7, %s1018_s29 }
  0x48   : > { %p1026_p13 = scmp.lt.u32.totalorder %s1018_s29, %s1307_s28 }
  0x49   : > { %p1020_p1 = pnand %p1019_p12, %p810_p3  ;;  %p1025_p11 = por %p1024_p10, %p1023_p7 }
  0x4b   : > { %p1021_p6 = pneg %p1020_p1  ;;  %p1027_p0 = por %p1026_p13, %p1025_p11 }
  0x4d   : > { %p1028_p2 = pnand %p1027_p0, %p1021_p6 }
  0x4f   : > { %1031 = shalt.err (!%p1028_p2)
}
  0x50   : > { %s1032_s12 = scalar_lea.vmem %s1309_s5, %s1296_s22  ;;  %s1169_s18 = smov [#allocation4]  }
  0x51   : > { %p1033_p4 = scmp.ne.s32.totalorder %s1309_s5, %s1032_s12  ;;  %s1036_s20 = sshll.u32 %s1169_s18, 4  ;;  %s1037_s20 = int_to_ptr.vmem [resolvable:$false] %s1036_s20 }
  0x52   : > { %s1038_s26 = scalar_lea.vmem %s1037_s20, 3072  ;;  %p1039_p12 = scmp.lt.s32.totalorder %s1309_s5, %s1037_s20 }
  0x53   : > { %p1034_p5 = pnand %p1033_p4, %p810_p3  ;;  %p1040_p1 = scmp.lt.s32.totalorder %s1038_s26, %s1032_s12 }
  0x55   : > { %p1035_p9 = pneg %p1034_p5  ;;  %p1041_p7 = por %p1040_p1, %p1039_p12 }
  0x57   : > { %p1042_p10 = pnand %p1041_p7, %p1035_p9 }
  0x59   : > { %1045 = shalt.err (!%p1042_p10)
}
  0x5a   : > { %s1170_s30 = smov 256   ;;  %s1171_s21 = smov 16  }
  0x5b   : > { %215 = dma.hbm_to_vmem [thread:$0]  (%p810_p3), %s1307_s28, %s1296_s22, %s1309_s5, %s1299_s27, %s1170_s30, %s1170_s30, %s1171_s21  }
  0x5c PF: > { %p815_p6 = scmp.ge.s32.totalorder %s1132_s17, 1  ;;  %p234_p11 = scmp.lt.s32.totalorder %s1132_s17, 3 }
  0x5e   : > { %p235_p13 = pnand %p815_p6, %p234_p11 }
  0x5f   : > { %s240_s8 = sand.u32 (!%p235_p13), 1, %s1116_s13  }
  0x60   : > { %238 = sbr.rel (%p235_p13) target bundleno = 356 (0x164), region = 32  ;;  %s241_s29 = scalar_lea.sflag (!%p235_p13), [#allocation3], %s240_s8 }
  0x61   : > { %s840_s11 = smul.u32 (!%p235_p13), 96, %s240_s8 }
  0x63   : > { %s1339_s4 = scalar_lea.vmem (!%p235_p13), [#allocation2], %s840_s11 }
  0x67   : > { %1103 = dma.done.wait (%p1236_p8), %s241_s29, 1536  }
  0x68   : > { %1105 = vsyncadd (%p1236_p8), %s241_s29, 4294965760  ;;  %s250_s22 = scalar_lea.sflag [#allocation5], %s240_s8  ;;  %s1345_s27 = scalar_lea.vmem [#allocation4], %s840_s11 }
  0x69   : > { %1107 = dma.done.wait (%p1236_p8), %s250_s22, 1536  }
  0x6a   : > { %1109 = vsyncadd (%p1236_p8), %s250_s22, 4294965760  ;;  %s841_s5 = smul.u32 48, %s240_s8  ;;  %vm326_vm0 = vcmask 7168   ;;  %v1172_v0 = vmov 0.0   ;;  %v1366_v1 = vld [vmem:[%s1345_s27 + $0x20] sm:$0xff]  ;;  %v1369_v2 = vld [vmem:[%s1345_s27 + $0x28] sm:$0xff] }
  0x6b   : > { %vm367_vm1 = vcmp.gt.f32.partialorder %v1366_v1, 0.0  ;;  %vm368_vm2 = vcmp.gt.f32.partialorder %v1369_v2, 0.0  ;;  %v1375_v4 = vld [vmem:[%s1345_s27] sm:$0xff]  ;;  %v1378_v5 = vld [vmem:[%s1345_s27 + $0x8] sm:$0xff]  ;;  %v1384_v7 = vld [vmem:[%s1345_s27 + $0x30] sm:$0xff]  ;;  %vm435_vm13 = vcmask 588800  }
  0x6c   : > { %s1351_s28 = scalar_lea.vmem [#allocation6], %s841_s5   ;;  %v379_v3 = vsel %vm367_vm1, %v1366_v1, 1.0  ;;  %v380_v6 = vsel %vm368_vm2, %v1369_v2, 1.0  ;;  %vm363_vm3 = vcmp.gt.f32.partialorder %v1375_v4, 0.0  ;;  %vm364_vm4 = vcmp.gt.f32.partialorder %v1378_v5, 0.0  ;;  %v1387_v8 = vld [vmem:[%s1345_s27 + $0x38] sm:$0xff] }
  0x6d   : > { %329 = vst.msk [vmem:[%s1351_s28 + $0x10] sm:$0xff] %vm326_vm0, %v1172_v0  ;;  %327 = vst.msk [vmem:[%s1351_s28] sm:$0xff] %vm326_vm0, %v1172_v0  ;;  %962 = vlog2.f32 %v379_v3  ;;  %v375_v9 = vsel %vm363_vm3, %v1375_v4, 1.0  ;;  %v376_v10 = vsel %vm364_vm4, %v1378_v5, 1.0  ;;  %vm369_vm5 = vcmp.gt.f32.partialorder %v1384_v7, 0.0  ;;  %v1393_v11 = vld [vmem:[%s1345_s27 + $0x10] sm:$0xff] }
  0x6e   : > { %328 = vst.msk [vmem:[%s1351_s28 + $0x8] sm:$0xff] %vm326_vm0, %v1172_v0  ;;  %330 = vst.msk [vmem:[%s1351_s28 + $0x18] sm:$0xff] %vm326_vm0, %v1172_v0  ;;  %964 = vlog2.f32 %v380_v6  ;;  %vm370_vm6 = vcmp.gt.f32.partialorder %v1387_v8, 0.0  ;;  %v381_v12 = vsel %vm369_vm5, %v1384_v7, 1.0  ;;  %v1398_v13 = vld [vmem:[%s1345_s27 + $0x18] sm:$0xff]  ;;  %vm365_vm7 = vcmp.gt.f32.partialorder %v1393_v11, 0.0 }
  0x6f   : > { %331 = vst.msk [vmem:[%s1351_s28 + $0x20] sm:$0xff] %vm326_vm0, %v1172_v0  ;;  %332 = vst.msk [vmem:[%s1351_s28 + $0x28] sm:$0xff] %vm326_vm0, %v1172_v0  ;;  %966 = vlog2.f32 %v375_v9  ;;  %v382_v14 = vsel %vm370_vm6, %v1387_v8, 1.0  ;;  %vm366_vm8 = vcmp.gt.f32.partialorder %v1398_v13, 0.0  ;;  %v377_v15 = vsel %vm365_vm7, %v1393_v11, 1.0  ;;  %v1405_v16 = vld [vmem:[%s1345_s27 + $0x50] sm:$0xff] }
  0x70   : > { %968 = vlog2.f32 %v376_v10  ;;  %v1408_v17 = vld [vmem:[%s1345_s27 + $0x58] sm:$0xff]  ;;  %v378_v18 = vsel %vm366_vm8, %v1398_v13, 1.0  ;;  %vm373_vm9 = vcmp.gt.f32.partialorder %v1405_v16, 0.0  ;;  %v1414_v19 = vld [vmem:[%s1345_s27 + $0x40] sm:$0xff]  ;;  %v1417_v20 = vld [vmem:[%s1345_s27 + $0x48] sm:$0xff]  ;;  %s1456_s23 = smul.u32 6, %s1124_s15 }
  0x71   : > { %970 = vlog2.f32 %v381_v12  ;;  %vm374_vm10 = vcmp.gt.f32.partialorder %v1408_v17, 0.0  ;;  %v385_v21 = vsel %vm373_vm9, %v1405_v16, 1.0  ;;  %vm371_vm11 = vcmp.gt.f32.partialorder %v1414_v19, 0.0  ;;  %v343_v26 = vld [vmem:[%s1339_s4 + $0x20] sm:$0xff]  ;;  %v344_v28 = vld [vmem:[%s1339_s4 + $0x28] sm:$0xff]  ;;  %v345_v40 = vld [vmem:[%s1339_s4 + $0x30] sm:$0xff] }
  0x72   : > { %972 = vlog2.f32 %v382_v14  ;;  %v386_v22 = vsel %vm374_vm10, %v1408_v17, 1.0  ;;  %vm372_vm12 = vcmp.gt.f32.partialorder %v1417_v20, 0.0  ;;  %v383_v23 = vsel %vm371_vm11, %v1414_v19, 1.0  ;;  %v339_v32 = vld [vmem:[%s1339_s4] sm:$0xff]  ;;  %v340_v35 = vld [vmem:[%s1339_s4 + $0x8] sm:$0xff]  ;;  %v346_v44 = vld [vmem:[%s1339_s4 + $0x38] sm:$0xff] }
  0x73   : > { %974 = vlog2.f32 %v377_v15  ;;  %v384_v24 = vsel %vm372_vm12, %v1417_v20, 1.0  ;;  %v341_v50 = vld [vmem:[%s1339_s4 + $0x10] sm:$0xff]  ;;  %v342_v54 = vld [vmem:[%s1339_s4 + $0x18] sm:$0xff]  ;;  %v347_v14 = vld [vmem:[%s1339_s4 + $0x40] sm:$0xff]  ;;  %p308_p8 = scmp.lt.s32.totalorder %s1456_s23, 6  ;;  %p1578_p3 = scmp.ne.s32.totalorder %s1577_s25, 0 }
  0x74   : > { %976 = vlog2.f32 %v378_v18  ;;  %v349_v61 = vld [vmem:[%s1339_s4 + $0x50] sm:$0xff]  ;;  %s508_s18 = ssub.s32 (%p1578_p3), 7, %s1456_s23  ;;  %s835_s20 = smul.u32 (%p1578_p3), 48, %s1124_s15 }
  0x75   : > { %978 = vlog2.f32 %v385_v21  ;;  %s309_s6 = scalar_select %p308_p8, %s1456_s23, 6 }
  0x76   : > { %980 = vlog2.f32 %v386_v22  ;;  %v348_v22 = vld [vmem:[%s1339_s4 + $0x48] sm:$0xff]  ;;  %p509_p0 = scmp.lt.s32.totalorder (%p1578_p3), %s508_s18, 6  ;;  %s1514_s21 = scalar_lea.vmem (%p1578_p3), %s1574_s3, %s835_s20  }
  0x77   : > { %v963_v25 = vpop.eup %962  ;;  %982 = vlog2.f32 %v383_v23  ;;  %s816_s7 = sshll.u32 %s309_s6, 3 }
  0x78   : > { %v965_v27 = vpop.eup %964  ;;  %v396_v29 = vmul.f32 0.6931472, %v963_v25  ;;  %984 = vlog2.f32 %v384_v24  ;;  %s1469_s12 = scalar_lea.vmem %s1573_s2, %s816_s7 }
  0x79   : > { %v967_v30 = vpop.eup %966  ;;  %v398_v31 = vmul.f32 0.6931472, %v965_v27 }
  0x7a   : > { %v969_v33 = vpop.eup %968  ;;  %v415_v34 = vsub.f32 %v396_v29, %v343_v26  ;;  %v388_v36 = vmul.f32 0.6931472, %v967_v30 }
  0x7b   : > { %v971_v37 = vpop.eup %970  ;;  %v416_v38 = vsub.f32 %v398_v31, %v344_v28  ;;  %v390_v39 = vmul.f32 0.6931472, %v969_v33 }
  0x7c   : > { %v973_v41 = vpop.eup %972  ;;  %v427_v42 = vmul.f32 %v415_v34, %v1366_v1  ;;  %v411_v43 = vsub.f32 %v388_v36, %v339_v32  ;;  %v400_v45 = vmul.f32 0.6931472, %v971_v37 }
  0x7d   : > { %v975_v46 = vpop.eup %974  ;;  %v428_v47 = vmul.f32 %v416_v38, %v1369_v2  ;;  %v412_v48 = vsub.f32 %v390_v39, %v340_v35  ;;  %v402_v49 = vmul.f32 0.6931472, %v973_v41  ;;  %v350_v2 = vld [vmem:[%s1339_s4 + $0x58] sm:$0xff]  ;;  %v333_v35 = vld [vmem:[%s1351_s28] sm:$0xff] }
  0x7e   : > { %v977_v51 = vpop.eup %976  ;;  %v423_v52 = vmul.f32 %v411_v43, %v1375_v4  ;;  %v417_v53 = vsub.f32 %v400_v45, %v345_v40  ;;  %v392_v55 = vmul.f32 0.6931472, %v975_v46  ;;  %v336_v38 = vld [vmem:[%s1351_s28 + $0x18] sm:$0xff]  ;;  %v334_v41 = vld [vmem:[%s1351_s28 + $0x8] sm:$0xff]  ;;  %v484_v46 = vld [vmem:[%s1469_s12 + $0x10] sm:$0xff] }
  0x7f   : > { %v979_v56 = vpop.eup %978  ;;  %v444_v57 = vsel %vm435_vm13, %v428_v47, 0.0  ;;  %v424_v58 = vmul.f32 %v412_v48, %v1378_v5  ;;  %v418_v59 = vsub.f32 %v402_v49, %v346_v44  ;;  %v394_v60 = vmul.f32 0.6931472, %v977_v51  ;;  %v338_v44 = vld [vmem:[%s1351_s28 + $0x28] sm:$0xff]  ;;  %v337_v48 = vld [vmem:[%s1351_s28 + $0x20] sm:$0xff] }
  0x80   : > { %v981_v62 = vpop.eup %980  ;;  %v445_v63 = vadd.f32 %v444_v57, %v427_v42  ;;  %v429_v0 = vmul.f32 %v417_v53, %v1384_v7  ;;  %v413_v1 = vsub.f32 %v392_v55, %v341_v50  ;;  %v408_v3 = vmul.f32 0.6931472, %v979_v56  ;;  %v482_v51 = vld [vmem:[%s1469_s12] sm:$0xff]  ;;  %v485_v56 = vld [vmem:[%s1469_s12 + $0x18] sm:$0xff] }
  0x81   : > { %v983_v4 = vpop.eup %982  ;;  %v436_v6 = vsel %vm435_vm13, %v424_v58, 0.0  ;;  %v430_v9 = vmul.f32 %v418_v59, %v1387_v8  ;;  %v414_v10 = vsub.f32 %v394_v60, %v342_v54  ;;  %v410_v12 = vmul.f32 0.6931472, %v981_v62  ;;  %v483_v59 = vld [vmem:[%s1469_s12 + $0x8] sm:$0xff] }
  0x82   : > { %v985_v5 = vpop.eup %984  ;;  %446 = vadd.xlane.f32.xlu1 %v445_v63  ;;  %v437_v15 = vadd.f32 %v436_v6, %v423_v52  ;;  %v425_v18 = vmul.f32 %v413_v1, %v1393_v11  ;;  %v421_v21 = vsub.f32 %v408_v3, %v349_v61  ;;  %v404_v23 = vmul.f32 0.6931472, %v983_v4  ;;  %v487_v62 = vld [vmem:[%s1469_s12 + $0x28] sm:$0xff]  ;;  %v486_v1 = vld [vmem:[%s1469_s12 + $0x20] sm:$0xff] }
  0x83   : > { %v448_v7 = vsel %vm435_vm13, %v430_v9, 0.0  ;;  %v426_v24 = vmul.f32 %v414_v10, %v1398_v13  ;;  %v422_v25 = vsub.f32 %v410_v12, %v350_v2  ;;  %v406_v26 = vmul.f32 0.6931472, %v985_v5 }
  0x84   : > { %438 = vadd.xlane.f32.xlu0 %v437_v15  ;;  %v449_v27 = vadd.f32 %v448_v7, %v429_v0  ;;  %v433_v8 = vmul.f32 %v421_v21, %v1405_v16  ;;  %v419_v28 = vsub.f32 %v404_v23, %v347_v14 }
  0x85   : > { %v440_v29 = vsel %vm435_vm13, %v426_v24, 0.0  ;;  %v434_v30 = vmul.f32 %v422_v25, %v1408_v17  ;;  %v420_v11 = vsub.f32 %v406_v26, %v348_v22 }
  0x86   : > { %450 = vadd.xlane.f32.xlu1 %v449_v27  ;;  %v441_v31 = vadd.f32 %v440_v29, %v425_v18  ;;  %v431_v32 = vmul.f32 %v419_v28, %v1414_v19  ;;  %v335_v19 = vld [vmem:[%s1351_s28 + $0x10] sm:$0xff] }
  0x87   : > { %v456_v13 = vsel %vm435_vm13, %v434_v30, 0.0  ;;  %v432_v33 = vmul.f32 %v420_v11, %v1417_v20 }
  0x88   : > { %442 = vadd.xlane.f32.xlu0 %v441_v31  ;;  %v457_v16 = vadd.f32 %v456_v13, %v433_v8 }
  0x89   : > { %v452_v34 = vsel %vm435_vm13, %v432_v33, 0.0 }
  0x8a   : > { %458 = vadd.xlane.f32.xlu1 %v457_v16  ;;  %v453_v17 = vadd.f32 %v452_v34, %v431_v32 }
  0x8c   : > { %454 = vadd.xlane.f32.xlu0 %v453_v17 }
 0x10f   : > { %v447_v20 = vpop.xlane.xlu1 %446 }
 0x110   : > { %v462_v36 = vadd.f32 %v447_v20, %v335_v19 }
 0x111   : > { %v439_v37 = vpop.xlane.xlu0 %438 }
 0x112   : > { %469 = vst.msk [vmem:[%s1351_s28 + $0x10] sm:$0xff] %vm326_vm0, %v462_v36  ;;  %v460_v39 = vadd.f32 %v439_v37, %v333_v35 }
 0x113   : > { %v451_v40 = vpop.xlane.xlu1 %450 }
 0x114   : > { %467 = vst.msk [vmem:[%s1351_s28] sm:$0xff] %vm326_vm0, %v460_v39  ;;  %v463_v42 = vadd.f32 %v451_v40, %v336_v38 }
 0x115   : > { %v443_v43 = vpop.xlane.xlu0 %442 }
 0x116   : > { %470 = vst.msk [vmem:[%s1351_s28 + $0x18] sm:$0xff] %vm326_vm0, %v463_v42  ;;  %v461_v45 = vadd.f32 %v443_v43, %v334_v41 }
 0x117   : > { %v459_v47 = vpop.xlane.xlu1 %458 }
 0x118   : > { %468 = vst.msk [vmem:[%s1351_s28 + $0x8] sm:$0xff] %vm326_vm0, %v461_v45  ;;  %v465_v49 = vadd.f32 %v459_v47, %v338_v44 }
 0x119   : > { %v478_v50 = vld [vmem:[%s1351_s28 + $0x10] sm:$0xff]  ;;  %v455_v52 = vpop.xlane.xlu0 %454 }
 0x11a   : > { %v490_v53 = vmul.f32 %v484_v46, %v478_v50  ;;  %472 = vst.msk [vmem:[%s1351_s28 + $0x28] sm:$0xff] %vm326_vm0, %v465_v49  ;;  %v464_v54 = vadd.f32 %v455_v52, %v337_v48 }
 0x11b   : > { %v476_v55 = vld [vmem:[%s1351_s28] sm:$0xff] }
 0x11c   : > { %496 = vst.msk [vmem:[%s1351_s28 + $0x10] sm:$0xff] %vm326_vm0, %v490_v53  ;;  %v488_v57 = vmul.f32 %v482_v51, %v476_v55  ;;  %471 = vst.msk [vmem:[%s1351_s28 + $0x20] sm:$0xff] %vm326_vm0, %v464_v54 }
 0x11d   : > { %v479_v58 = vld [vmem:[%s1351_s28 + $0x18] sm:$0xff] }
 0x11e   : > { %494 = vst.msk [vmem:[%s1351_s28] sm:$0xff] %vm326_vm0, %v488_v57  ;;  %v491_v60 = vmul.f32 %v485_v56, %v479_v58 }
 0x11f   : > { %v477_v61 = vld [vmem:[%s1351_s28 + $0x8] sm:$0xff] }
 0x120   : > { %497 = vst.msk [vmem:[%s1351_s28 + $0x18] sm:$0xff] %vm326_vm0, %v491_v60  ;;  %v489_v63 = vmul.f32 %v483_v59, %v477_v61  ;;  %506 = sbr.rel (!%p1578_p3) target bundleno = 356 (0x164), region = 52 }
 0x121   : > { %v481_v0 = vld [vmem:[%s1351_s28 + $0x28] sm:$0xff] }
 0x122   : > { %495 = vst.msk [vmem:[%s1351_s28 + $0x8] sm:$0xff] %vm326_vm0, %v489_v63  ;;  %v493_v2 = vmul.f32 %v487_v62, %v481_v0 }
 0x123   : > { %v480_v3 = vld [vmem:[%s1351_s28 + $0x20] sm:$0xff] }
 0x124   : > { %499 = vst.msk [vmem:[%s1351_s28 + $0x28] sm:$0xff] %vm326_vm0, %v493_v2  ;;  %v492_v4 = vmul.f32 %v486_v1, %v480_v3 }
 0x126   : > { %498 = vst.msk [vmem:[%s1351_s28 + $0x20] sm:$0xff] %vm326_vm0, %v492_v4 }
 0x127   : > { %s1594_s18 = smov (!%p509_p0, %s508_s18), 6 }
 0x128   : > { %s817_s8 = sshll.u32 %s1594_s18, 7 }
 0x129   : > { %p820_p2 = scmp.eq.s32.totalorder %s817_s8, 0 }
 0x12a   : > { %986 = sdivrem.u32 (!%p820_p2), %s1594_s18, 6 }
 0x12b   : > { %517 = sbr.rel (%p820_p2) target bundleno = 356 (0x164), region = 56 }
 0x133   : > { %s1520_s25 = spop.drf %986 }
 0x134   : > { %p821_p4 = scmp.le.s32.totalorder %s1520_s25, 0 }
 0x135   : > { %s1579_s15 = smov (!%p821_p4), %s1514_s21  ;;  %s1580_s11 = smov (!%p821_p4), %s1351_s28 }
 0x136   : > { %727 = sbr.rel (%p821_p4) target bundleno = 327 (0x147), region = 150  ;;  %s1529_s29 = smov (!%p821_p4), 0  }
 0x137   : > { %s1531_s4 = smov (!%p821_p4), 0  }
 0x13d LB: >> { %v591_v6 = vld [vmem:[%s1140_s11] sm:$0xff]  ;;  %v593_v9 = vld [vmem:[%s1140_s11 + $0x8] sm:$0xff]  ;;  %v595_v10 = vld [vmem:[%s1140_s11 + $0x10] sm:$0xff]  ;;  %s603_s22 = sadd.s32 1, %s1144_s29  ;;  %s585_s4 = sadd.s32 1, %s1148_s4   ;;  %s1148_s4 = sphi %s1531_s4, %s585_s4   ;;  %s1144_s29 = sphi %s1529_s29, %s1581_s29   ;;  %s1140_s11 = sphi %s1580_s11, %s608_s11   ;;  %s1136_s15 = sphi %s1579_s15, %s609_s15  }
 0x13e   : >> { %592 = vst [vmem:[%s1136_s15] sm:$0xff] %v591_v6  ;;  %594 = vst [vmem:[%s1136_s15 + $0x8] sm:$0xff] %v593_v9  ;;  %v597_v12 = vld [vmem:[%s1140_s11 + $0x18] sm:$0xff]  ;;  %v599_v14 = vld [vmem:[%s1140_s11 + $0x20] sm:$0xff]  ;;  %p604_p5 = scmp.ge.s32.totalorder %s603_s22, %s1520_s25  ;;  %p584_p9 = scmp.ge.s32.totalorder %s585_s4, %s1520_s25 }
 0x13f   : >> { %596 = vst [vmem:[%s1136_s15 + $0x10] sm:$0xff] %v595_v10  ;;  %v601_v5 = vld [vmem:[%s1140_s11 + $0x28] sm:$0xff]  ;;  %598 = vst [vmem:[%s1136_s15 + $0x18] sm:$0xff] %v597_v12 }
 0x140   : >> { %600 = vst [vmem:[%s1136_s15 + $0x20] sm:$0xff] %v599_v14  ;;  %602 = vst [vmem:[%s1136_s15 + $0x28] sm:$0xff] %v601_v5  ;;  %s1596_s22 = smov (%p604_p5, %s603_s22), 0  ;;  %587 = sbr.rel (!%p584_p9) target bundleno = 317 (0x13d), region = 156 }
 0x141   : >> { %s606_s27 = smul.u32 48, %s1596_s22  ;;  %s1581_s29 = smov %s1596_s22 }
 0x143   : >> { %s608_s11 = scalar_lea.vmem %s1351_s28, %s606_s27 [#allocation6]   ;;  %s609_s15 = scalar_lea.vmem %s1514_s21, %s606_s27  }
 0x147 PF: > { %988 = sdivrem.u32 %s1594_s18, 6 }
 0x148   : > { %s822_s5 = smul.u32 48, %s1520_s25 }
 0x14a   : > { %s614_s23 = scalar_lea.vmem %s1351_s28, %s822_s5 [#allocation6]   ;;  %s616_s6 = scalar_lea.vmem %s1514_s21, %s822_s5  }
 0x150   : > { %s989_s7 = spop.drf %988 }
 0x151   : > { %p824_p12 = scmp.le.s32.totalorder %s989_s7, 0 }
 0x152   : > { %s1150_s9 = smov (!%p824_p12), %s616_s6   ;;  %s1154_s10 = smov (!%p824_p12), %s614_s23  }
 0x153   : > { %741 = sbr.rel (%p824_p12) target bundleno = 356 (0x164), region = 161  ;;  %s1158_s12 = smov (!%p824_p12), 0  }
 0x154   : > { %s1162_s20 = smov (!%p824_p12), 0  }
 0x15a LB: >> { %v626_v15 = vld [vmem:[%s1156_s10] sm:$0xff]  ;;  %s628_s26 = sadd.s32 1, %s1160_s12  ;;  %s620_s20 = sadd.s32 1, %s1164_s20   ;;  %s1164_s20 = sphi %s1162_s20, %s620_s20   ;;  %s1160_s12 = sphi %s1158_s12, %s1159_s12   ;;  %s1156_s10 = sphi %s1154_s10, %s633_s10   ;;  %s1152_s9 = sphi %s1150_s9, %s634_s9  }
 0x15b   : >> { %627 = vst [vmem:[%s1152_s9] sm:$0xff] %v626_v15  ;;  %p629_p1 = scmp.ge.s32.totalorder %s628_s26, %s989_s7  ;;  %p619_p7 = scmp.ge.s32.totalorder %s620_s20, %s989_s7 }
 0x15d   : >> { %s1598_s26 = smov (%p629_p1, %s628_s26), 0  ;;  %622 = sbr.rel (!%p619_p7) target bundleno = 346 (0x15a), region = 167 }
 0x15e   : >> { %s825_s28 = sshll.u32 %s1598_s26, 3  ;;  %s1159_s12 = smov %s1598_s26  }
 0x15f   : >> { %s633_s10 = scalar_lea.vmem %s614_s23, %s825_s28 [#allocation6]   ;;  %s634_s9 = scalar_lea.vmem %s616_s6, %s825_s28  }
 0x164 PF: > { %s19_s17 = sadd.s32 1, %s1132_s17   ;;  %s1582_s12 = smov %s1116_s13 }
 0x165   : > { %p16_p10 = scmp.ge.s32.totalorder %s19_s17, 4   ;;  %s1583_s13 = smov %s1120_s14 }
 0x166   : > { %s1584_s14 = smov %s1241_s24  ;;  %s1585_s15 = smov %s1128_s16 }
 0x167   : > { %s1586_s16 = smov %s1588_s19  ;;  %18 = sbr.rel (!%p16_p10) target bundleno = 6 (0x6), region = 178 }
 0x16e   :  { %650 = vsyncpa [#allocation3], 1 }
 0x16f   :  { %652 = vsyncpa [#allocation3 + $0x1], 1 }
 0x170   :  { %653 = vsyncpa [#allocation5], 1 }
 0x171   :  { %655 = vsyncpa [#allocation5 + $0x1], 1 }

</bundles_post_ra>
